<compile_context>
chip_gen: v7x
topology: tpu7x:2x2x1
jax: 0.10.0
libtpu: 0.0.40
codegen_flags: <defaults>
</compile_context>

<pallas_src>
import functools

import jax
import jax.numpy as jnp
from jax.experimental import pallas as pl
from jax.experimental.pallas import tpu as pltpu


def _round_up(a, b):
    return (a + b - 1) // b * b


def _timeblock_kernel(x_ref, w_ref, b_ref, o_ref, *, c_out):
    # x_ref : (K*C_in, tm)    im2col'd input tile, lanes = (row, t_out) positions
    # w_ref : (3*C_out, K*C_in)  fused conv1|conv2|conv3 weights
    # b_ref : (3*C_out, 1)       fused biases (f32)
    # o_ref : (C_out, tm)        lane-dense output tile
    # Single MXU matmul for all 3 convs and all K taps, f32 accumulation.
    y = jnp.dot(w_ref[...], x_ref[...], preferred_element_type=jnp.float32)
    y = y + b_ref[...]                              # bias per output channel
    c2 = jax.nn.sigmoid(y[c_out:2 * c_out, :])      # conv2 -> sigmoid (EUP)
    out = jax.nn.relu(y[:c_out, :] + c2 + y[2 * c_out:, :])
    o_ref[...] = out.astype(o_ref.dtype)


def timeblock_forward(x, params, *, kernel_size=3, tile_m=512,
                      compute_dtype=jnp.float32):
    """x: (B, N, T, C_in) float32 -> (B, N, T-K+1, C_out) float32.

    compute_dtype=jnp.bfloat16 halves DMA bytes / matches the bf16 MXU on
    v6e/v7x (accumulation stays f32).
    """
    w1, b1, w2, b2, w3, b3 = params
    B, N, T, C_in = x.shape
    K, _, C_out = w1.shape
    assert K == kernel_size
    T_out = T - K + 1
    Kc = K * C_in
    R = B * N
    M = R * T_out

    # ---- wrapper-side layout plumbing (im2col + transpose) ------------------
    x2 = x.reshape(R, T, C_in)
    # (R, T_out, K*C_in); channel order is tap-major (k*C_in + c), matching the
    # weight reshape below.
    xc = jnp.concatenate([x2[:, k:k + T_out, :] for k in range(K)], axis=-1)
    xcT = xc.reshape(M, Kc).T.astype(compute_dtype)          # (Kc, M)

    # Fused weights/biases for the 3 convs.
    w_cat = jnp.concatenate(
        [w1.reshape(Kc, C_out), w2.reshape(Kc, C_out), w3.reshape(Kc, C_out)],
        axis=1)                                              # (Kc, 3*C_out)
    wT = w_cat.T.astype(compute_dtype)                       # (3*C_out, Kc)
    b_cat = jnp.concatenate([b1, b2, b3]).reshape(3 * C_out, 1)
    b_cat = b_cat.astype(jnp.float32)

    # ---- tiling: large, lane-dense M tile; pad instead of asserting ---------
    tile_m = max(128, _round_up(tile_m, 128))
    tm = min(tile_m, _round_up(M, 128))
    M_pad = _round_up(M, tm)
    if M_pad != M:
        xcT = jnp.pad(xcT, ((0, 0), (0, M_pad - M)))
    grid = (M_pad // tm,)

    itemsize = jnp.dtype(compute_dtype).itemsize
    cost = pl.CostEstimate(
        flops=2 * M_pad * Kc * 3 * C_out,
        transcendentals=M_pad * C_out,
        bytes_accessed=(Kc * M_pad + 3 * C_out * Kc) * itemsize
        + 3 * C_out * 4 + C_out * M_pad * 4,
    )

    out_t = pl.pallas_call(
        functools.partial(_timeblock_kernel, c_out=C_out),
        out_shape=jax.ShapeDtypeStruct((C_out, M_pad), jnp.float32),
        grid_spec=pltpu.PrefetchScalarGridSpec(
            num_scalar_prefetch=0,
            grid=grid,
            in_specs=[
                pl.BlockSpec((Kc, tm), lambda i: (0, i)),          # x tile
                pl.BlockSpec((3 * C_out, Kc), lambda i: (0, 0)),   # weights
                pl.BlockSpec((3 * C_out, 1), lambda i: (0, 0)),    # biases
            ],
            out_specs=pl.BlockSpec((C_out, tm), lambda i: (0, i)),
        ),
        compiler_params=pltpu.CompilerParams(
            dimension_semantics=("parallel",),
            vmem_limit_bytes=32 * 1024 * 1024,   # explicit; safe on 64 MiB v7x
        ),
        cost_estimate=cost,
    )(xcT, wT, b_cat)

    out = out_t[:, :M].T.reshape(R, T_out, C_out)
    return out.reshape(B, N, T_out, C_out)


def _reference_forward(x, params, kernel_size=3):
    """Plain-JAX reference mirroring the PyTorch module."""
    w1, b1, w2, b2, w3, b3 = params
    K = kernel_size
    T_out = x.shape[2] - K + 1

    def conv(w, b):
        acc = jnp.zeros(x.shape[:2] + (T_out, w.shape[2]), jnp.float32)
        for k in range(K):
            acc = acc + jnp.einsum('bntc,cd->bntd', x[:, :, k:k + T_out, :], w[k])
        return acc + b
    return jax.nn.relu(conv(w1, b1) + jax.nn.sigmoid(conv(w2, b2)) + conv(w3, b3))


def init_params(key, in_channels, out_channels, kernel_size=3):
    """Deterministic synthetic weights. Stored as (K, C_in, C_out) + (C_out,)."""
    keys = jax.random.split(key, 6)
    fan_in = in_channels * kernel_size
    bound = 1.0 / jnp.sqrt(fan_in)

    def w(k):
        return jax.random.uniform(
            k, (kernel_size, in_channels, out_channels),
            minval=-bound, maxval=bound, dtype=jnp.float32)

    def b(k):
        return jax.random.uniform(
            k, (out_channels,), minval=-bound, maxval=bound, dtype=jnp.float32)

    return (w(keys[0]), b(keys[1]), w(keys[2]), b(keys[3]), w(keys[4]), b(keys[5]))


if __name__ == "__main__":
    key = jax.random.PRNGKey(0)
    k_x, k_p = jax.random.split(key)

    B, N, T, C_in, C_out, K = 2, 4, 16, 16, 32, 3
    x = jax.random.normal(k_x, (B, N, T, C_in), dtype=jnp.float32)
    params = init_params(k_p, C_in, C_out, K)

    out = timeblock_forward(x, params, kernel_size=K)
    out = jax.block_until_ready(out)

    ref = _reference_forward(x, params, kernel_size=K)
    assert out.shape == (B, N, T - K + 1, C_out), out.shape
    assert jnp.allclose(out, ref, atol=1e-4, rtol=1e-4), "mismatch vs reference"

    print("KERNEL_OK")
</pallas_src>

<mosaic_0001>
module attributes {stable_mosaic.version = 11 : i64} {
  func.func @_timeblock_kernel(%arg0: i32, %arg1: memref<48x128xf32, #tpu.memory_space<vmem>>, %arg2: memref<96x48xf32, #tpu.memory_space<vmem>>, %arg3: memref<96x1xf32, #tpu.memory_space<vmem>>, %arg4: memref<32x128xf32, #tpu.memory_space<vmem>>) attributes {dimension_semantics = [#tpu.dimension_semantics<parallel>], iteration_bounds = array<i64: 1>, scalar_prefetch = 0 : i64, scratch_operands = 0 : i64, tpu.core_type = #tpu.core_type<tc>, window_params = [{transform_indices = @transform_0, window_bounds = array<i64: 48, 128>}, {pipeline_mode = #tpu.pipeline_mode<synchronous>, transform_indices = @transform_1, window_bounds = array<i64: 96, 48>}, {pipeline_mode = #tpu.pipeline_mode<synchronous>, transform_indices = @transform_2, window_bounds = array<i64: 96, 1>}, {transform_indices = @transform_3, window_bounds = array<i64: 32, 128>}]} {
    %c0 = arith.constant 0 : index
    %c0_0 = arith.constant 0 : index
    %0 = vector.load %arg2[%c0, %c0_0] : memref<96x48xf32, #tpu.memory_space<vmem>>, vector<96x48xf32>
    %c0_1 = arith.constant 0 : index
    %c0_2 = arith.constant 0 : index
    %1 = vector.load %arg1[%c0_1, %c0_2] : memref<48x128xf32, #tpu.memory_space<vmem>>, vector<48x128xf32>
    %cst = arith.constant dense<0.000000e+00> : vector<96x128xf32>
    %2 = tpu.matmul %0, %1, %cst {dimension_numbers = #tpu.dot_dimension_numbers<[1], [0], [0], [1], [0, 0, 1, 1], [], []>} : vector<96x48xf32>, vector<48x128xf32>, vector<96x128xf32> -> vector<96x128xf32>
    %c0_3 = arith.constant 0 : index
    %c0_4 = arith.constant 0 : index
    %3 = vector.load %arg3[%c0_3, %c0_4] : memref<96x1xf32, #tpu.memory_space<vmem>>, vector<96x1xf32>
    %4 = vector.broadcast %3 : vector<96x1xf32> to vector<96x128xf32>
    %5 = arith.addf %2, %4 : vector<96x128xf32>
    %6 = vector.extract_strided_slice %5 {offsets = [32, 0], sizes = [32, 128], strides = [1, 1]} : vector<96x128xf32> to vector<32x128xf32>
    %7 = arith.negf %6 : vector<32x128xf32>
    %8 = math.exp %7 : vector<32x128xf32>
    %cst_5 = arith.constant 1.000000e+00 : f32
    %9 = vector.broadcast %cst_5 : f32 to vector<32x128xf32>
    %10 = arith.addf %9, %8 : vector<32x128xf32>
    %11 = arith.divf %9, %10 : vector<32x128xf32>
    %12 = vector.extract_strided_slice %5 {offsets = [0, 0], sizes = [32, 128], strides = [1, 1]} : vector<96x128xf32> to vector<32x128xf32>
    %13 = arith.addf %12, %11 : vector<32x128xf32>
    %14 = vector.extract_strided_slice %5 {offsets = [64, 0], sizes = [32, 128], strides = [1, 1]} : vector<96x128xf32> to vector<32x128xf32>
    %15 = arith.addf %13, %14 : vector<32x128xf32>
    %cst_6 = arith.constant 0.000000e+00 : f32
    %16 = vector.broadcast %cst_6 : f32 to vector<32x128xf32>
    %17 = arith.maximumf %15, %16 : vector<32x128xf32>
    %c0_7 = arith.constant 0 : index
    %c0_8 = arith.constant 0 : index
    %18 = vector.load %arg4[%c0_7, %c0_8] : memref<32x128xf32, #tpu.memory_space<vmem>>, vector<32x128xf32>
    tpu.vector_store %arg4[%c0_7, %c0_8], %17 {strides = array<i32>} : memref<32x128xf32, #tpu.memory_space<vmem>>, vector<32x128xf32>,
    return
  }
  func.func @transform_0(%arg0: i32) -> (i32, i32) {
    %c0_i32 = arith.constant 0 : i32
    %c0_i32_0 = arith.constant 0 : i32
    return %c0_i32, %arg0 : i32, i32
  }
  func.func @transform_1(%arg0: i32) -> (i32, i32) {
    %c0_i32 = arith.constant 0 : i32
    %c0_i32_0 = arith.constant 0 : i32
    %c0_i32_1 = arith.constant 0 : i32
    return %c0_i32, %c0_i32_0 : i32, i32
  }
  func.func @transform_2(%arg0: i32) -> (i32, i32) {
    %c0_i32 = arith.constant 0 : i32
    %c0_i32_0 = arith.constant 0 : i32
    %c0_i32_1 = arith.constant 0 : i32
    return %c0_i32, %c0_i32_0 : i32, i32
  }
  func.func @transform_3(%arg0: i32) -> (i32, i32) {
    %c0_i32 = arith.constant 0 : i32
    %c0_i32_0 = arith.constant 0 : i32
    return %c0_i32, %arg0 : i32, i32
  }
}

</mosaic_0001>

<bundles_post_ra>
// kernel: tpu_custom_call.1
= control target key start
LH: loop header
LB: loop body
LE: loop exit
PB: predicated region body
PF: predicated region fallthrough
CT: control target
= control target key end

     0   :  { %v467_v5 = vmov 0   ;;  %vm105_vm0 = vcmask 392192   ;;  %s605_s0 = inlined_call_operand.vmem [shape: f32[48,128], index: 0, kind: input, shape index: {}]   ;;  %s606_s1 = inlined_call_operand.vmem [shape: f32[96,48], index: 1, kind: input, shape index: {}]   ;;  %s607_s2 = inlined_call_operand.vmem [shape: f32[96,1], index: 2, kind: input, shape index: {}]   ;;  %s608_s3 = inlined_call_operand.hbm [shape: f32[32,128], index: 3, kind: output, shape index: {}]  }
   0x1   :  { %v27_v0 = vld [vmem:[%s605_s0] sm:$0xff]  ;;  %v28_v1 = vld [vmem:[%s605_s0 + $0x8] sm:$0xff]  ;;  %v29_v2 = vld [vmem:[%s605_s0 + $0x10] sm:$0xff]  ;;  %426 = vset.pattern.permute.xlu1 %v467_v5  ;;  %425 = vset.pattern.permute.xlu0 %v467_v5 }
   0x2   :  { %v387_v3 = vpack.c.bf16 %v28_v1, %v27_v0  ;;  %v30_v4 = vld [vmem:[%s605_s0 + $0x18] sm:$0xff]  ;;  %v31_v7 = vld [vmem:[%s605_s0 + $0x20] sm:$0xff]  ;;  %v32_v8 = vld [vmem:[%s605_s0 + $0x28] sm:$0xff] }
   0x3   :  { %v391_v6 = vpack.c.bf16 %v30_v4, %v29_v2  ;;  %v15_v9 = vld [vmem:[%s606_s1] sm:$0xff]  ;;  %v21_v10 = vld [vmem:[%s606_s1 + $0x30] sm:$0xff]  ;;  %v395_v11 = vpack.c.bf16 %v32_v8, %v31_v7  ;;  %v40_v14 = vld [vmem:[%s607_s2 + $0x38] sm:$0xff] }
   0x4   :  { %388 = vmatprep.subr.bf16.mxu0 %v387_v3  ;;  %399 = vmatprep.subr.bf16.mxu1 %v387_v3  ;;  %v39_v12 = vld [vmem:[%s607_s2 + $0x30] sm:$0xff]  ;;  %v37_v13 = vld [vmem:[%s607_s2 + $0x20] sm:$0xff]  ;;  %v38_v15 = vld [vmem:[%s607_s2 + $0x28] sm:$0xff] }
   0x5   :  { %390 = vmatpush3.bf16.msra.mxu0 %v387_v3  ;;  %402 = vmatpush3.bf16.msra.mxu1 %v387_v3 }
   0x6   :  { %392 = vmatprep.subr.bf16.mxu0 %v391_v6  ;;  %400 = vmatprep.subr.bf16.mxu1 %v391_v6 }
   0x7   :  { %369 = vmatprep.mubr.msk.f32.mxu0 %vm105_vm0, %v15_v9  ;;  %378 = vmatprep.mubr.msk.f32.mxu1 %vm105_vm0, %v21_v10 }
   0x8   :  { %77 = vperm.xlu1 %426, %v39_v12   ;;  %67 = vperm.xlu0 %425, %v37_v13  }
   0x9   :  { %394 = vmatpush3.bf16.msra.mxu0 %v391_v6  ;;  %403 = vmatpush3.bf16.msra.mxu1 %v391_v6 }
   0xa   :  { %396 = vmatprep.subr.bf16.mxu0 %v395_v11  ;;  %401 = vmatprep.subr.bf16.mxu1 %v395_v11 }
   0xb   :  { %8 = vsyncpa [#allocation3], 0  ;;  %v16_v16 = vld [vmem:[%s606_s1 + $0x8] sm:$0xff]  ;;  %v22_v17 = vld [vmem:[%s606_s1 + $0x38] sm:$0xff] }
   0xc   :  { %82 = vperm.xlu1 %426, %v40_v14   ;;  %72 = vperm.xlu0 %425, %v38_v15   ;;  %v17_v18 = vld [vmem:[%s606_s1 + $0x10] sm:$0xff]  ;;  %v23_v19 = vld [vmem:[%s606_s1 + $0x40] sm:$0xff]  ;;  %v34_v20 = vld [vmem:[%s607_s2 + $0x8] sm:$0xff] }
   0xd   :  { %398 = vmatpush3.bf16.msra.mxu0 %v395_v11  ;;  %404 = vmatpush3.bf16.msra.mxu1 %v395_v11  ;;  %v33_v21 = vld [vmem:[%s607_s2] sm:$0xff]  ;;  %v18_v22 = vld [vmem:[%s606_s1 + $0x18] sm:$0xff]  ;;  %v24_v23 = vld [vmem:[%s606_s1 + $0x48] sm:$0xff] }
   0xe   :  { %v19_v24 = vld [vmem:[%s606_s1 + $0x20] sm:$0xff]  ;;  %v25_v25 = vld [vmem:[%s606_s1 + $0x50] sm:$0xff]  ;;  %v36_v26 = vld [vmem:[%s607_s2 + $0x18] sm:$0xff] }
   0xf   :  { %v35_v27 = vld [vmem:[%s607_s2 + $0x10] sm:$0xff]  ;;  %v20_v28 = vld [vmem:[%s606_s1 + $0x28] sm:$0xff]  ;;  %v26_v29 = vld [vmem:[%s606_s1 + $0x58] sm:$0xff] }
  0x10   :  { %370 = vmatmul.mubr.msk.f32.vlgmr.msra.gmra.mrb[0].mxu0 %vm105_vm0, %v16_v16  ;;  %379 = vmatmul.mubr.msk.f32.vlgmr.msra.gmra.mrb[0].mxu1 %vm105_vm0, %v22_v17  ;;  %v42_v30 = vld [vmem:[%s607_s2 + $0x48] sm:$0xff]  ;;  %v41_v31 = vld [vmem:[%s607_s2 + $0x40] sm:$0xff]  ;;  %v44_v32 = vld [vmem:[%s607_s2 + $0x58] sm:$0xff] }
  0x11   :  { %372 = vmatprep.mubr.msk.f32.mxu0 %vm105_vm0, %v17_v18  ;;  %381 = vmatprep.mubr.msk.f32.mxu1 %vm105_vm0, %v23_v19  ;;  %v43_v33 = vld [vmem:[%s607_s2 + $0x50] sm:$0xff]  ;;  %s468_s2 = smov [#allocation2]  }
  0x12   :  { %52 = vperm.xlu1 %426, %v34_v20   ;;  %47 = vperm.xlu0 %425, %v33_v21   ;;  %s312_s15 = sshll.u32 %s468_s2, 4  ;;  %s313_s15 = int_to_ptr.vmem [resolvable:$true] %s312_s15 }
  0x13   :  { %s443_s16 = scalar_lea.vmem %s313_s15, 512  ;;  %p448_p1 = scmp.lt.s32.totalorder %s313_s15, %s313_s15 }
  0x14   :  { %373 = vmatmul.mubr.msk.f32.gmra.mrb[2].mxu0 %vm105_vm0, %v18_v22  ;;  %382 = vmatmul.mubr.msk.f32.gmra.mrb[2].mxu1 %vm105_vm0, %v24_v23  ;;  %p444_p0 = scmp.ne.s32.totalorder %s313_s15, %s443_s16  ;;  %p449_p2 = scmp.lt.s32.totalorder %s443_s16, %s443_s16 }
  0x15   :  { %375 = vmatprep.mubr.msk.f32.mxu0 %vm105_vm0, %v19_v24  ;;  %384 = vmatprep.mubr.msk.f32.mxu1 %vm105_vm0, %v25_v25 }
  0x16   :  { %62 = vperm.xlu1 %426, %v36_v26   ;;  %57 = vperm.xlu0 %425, %v35_v27   ;;  %p450_p3 = por %p449_p2, %p448_p1 }
  0x18   :  { %376 = vmatmul.mubr.msk.f32.gmra.mrb[4].mxu0 %vm105_vm0, %v20_v28  ;;  %385 = vmatmul.mubr.msk.f32.gmra.mrb[4].mxu1 %vm105_vm0, %v26_v29  ;;  %p451_p4 = pnand %p450_p3, %p444_p0 }
  0x1a   :  { %92 = vperm.xlu1 %426, %v42_v30   ;;  %87 = vperm.xlu0 %425, %v41_v31  }
  0x1e   :  { %102 = vperm.xlu1 %426, %v44_v32   ;;  %97 = vperm.xlu0 %425, %v43_v33  }
  0x87   :  { %v78_v34 = vpop.permute.xlu1 %77  ;;  %v68_v35 = vpop.permute.xlu0 %67 }
  0x8b   :  { %v83_v36 = vpop.permute.xlu1 %82  ;;  %v73_v37 = vpop.permute.xlu0 %72 }
  0x91   :  { %v53_v38 = vpop.permute.xlu1 %52  ;;  %v48_v39 = vpop.permute.xlu0 %47 }
  0x95   :  { %v63_v40 = vpop.permute.xlu1 %62  ;;  %v58_v41 = vpop.permute.xlu0 %57 }
  0x99   :  { %v93_v42 = vpop.permute.xlu1 %92  ;;  %v88_v43 = vpop.permute.xlu0 %87 }
  0x9a   :  { %v405_v44 = vadd.f32 %v93_v42, %v53_v38  ;;  %v409_v47 = vadd.f32 %v88_v43, %v48_v39 }
  0x9d   :  { %v103_v45 = vpop.permute.xlu1 %102  ;;  %v98_v46 = vpop.permute.xlu0 %97 }
  0x9e   :  { %v413_v56 = vadd.f32 %v103_v45, %v63_v40  ;;  %v417_v59 = vadd.f32 %v98_v46, %v58_v41 }
  0xe3   :  { %v371_v48 = vpop.f32.mrb[0].mxu0  ;;  %v380_v49 = vpop.f32.mrb[0].mxu1 }
  0xe4   :  { %v244_v50 = vadd.f32 %v380_v49, %v83_v36  ;;  %v208_v51 = vpop.f32.mrb[1].mxu0  ;;  %v238_v52 = vpop.f32.mrb[1].mxu1  ;;  %v406_v54 = vadd.f32 %v405_v44, %v371_v48 }
  0xe5   :  { %v239_v53 = vadd.f32 %v238_v52, %v78_v34  ;;  %v410_v57 = vadd.f32 %v409_v47, %v208_v51 }
  0xe6   :  { %v338_v55 = vmul.f32 -1.442695, %v244_v50 }
  0xe7   :  { %v337_v58 = vmul.f32 -1.442695, %v239_v53  ;;  %v374_v60 = vpop.f32.mrb[2].mxu0  ;;  %v383_v61 = vpop.f32.mrb[2].mxu1 }
  0xe8   :  { %427 = vpow2.f32 %v338_v55  ;;  %v407_v62 = vadd.f32 %v406_v54, %v383_v61  ;;  %v218_v63 = vpop.f32.mrb[3].mxu0  ;;  %v248_v0 = vpop.f32.mrb[3].mxu1  ;;  %v414_v2 = vadd.f32 %v413_v56, %v374_v60 }
  0xe9   :  { %429 = vpow2.f32 %v337_v58  ;;  %v411_v1 = vadd.f32 %v410_v57, %v248_v0  ;;  %v418_v3 = vadd.f32 %v417_v59, %v218_v63 }
  0xeb   :  { %v377_v4 = vpop.f32.mrb[4].mxu0  ;;  %v386_v5 = vpop.f32.mrb[4].mxu1 }
  0xec   :  { %v234_v6 = vadd.f32 %v377_v4, %v73_v37  ;;  %v415_v7 = vadd.f32 %v414_v2, %v386_v5  ;;  %v228_v8 = vpop.f32.mrb[5].mxu0  ;;  %v258_v9 = vpop.f32.mrb[5].mxu1 }
  0xed   :  { %v229_v10 = vadd.f32 %v228_v8, %v68_v35  ;;  %v419_v11 = vadd.f32 %v418_v3, %v258_v9 }
  0xee   :  { %v336_v12 = vmul.f32 -1.442695, %v234_v6 }
  0xef   :  { %v335_v13 = vmul.f32 -1.442695, %v229_v10 }
  0xf0   :  { %431 = vpow2.f32 %v336_v12 }
  0xf1   :  { %433 = vpow2.f32 %v335_v13 }
  0xf2   :  { %v428_v14 = vpop.eup %427 }
  0xf3   :  { %v430_v15 = vpop.eup %429  ;;  %v282_v16 = vadd.f32 1.0, %v428_v14 }
  0xf4   :  { %v281_v17 = vadd.f32 1.0, %v430_v15 }
  0xf5   :  { %435 = vrcp.f32 %v282_v16 }
  0xf6   :  { %437 = vrcp.f32 %v281_v17 }
  0xfa   :  { %v432_v18 = vpop.eup %431 }
  0xfb   :  { %v434_v19 = vpop.eup %433  ;;  %v280_v20 = vadd.f32 1.0, %v432_v18 }
  0xfc   :  { %v279_v21 = vadd.f32 1.0, %v434_v19 }
  0xfd   :  { %439 = vrcp.f32 %v280_v20 }
  0xfe   :  { %441 = vrcp.f32 %v279_v21 }
  0xff   :  { %v436_v22 = vpop.eup %435 }
 0x100   :  { %v438_v23 = vpop.eup %437  ;;  %v416_v24 = vadd.f32 %v436_v22, %v415_v7 }
 0x101   :  { %v420_v25 = vadd.f32 %v438_v23, %v419_v11 }
 0x102   :  { %v302_v26 = vmax.f32 %v416_v24, 0.0 }
 0x103   :  { %v301_v27 = vmax.f32 %v420_v25, 0.0 }
 0x104   :  { %306 = vst [vmem:[#allocation2 + $0x18] sm:$0xff] %v302_v26 }
 0x105   :  { %305 = vst [vmem:[#allocation2 + $0x10] sm:$0xff] %v301_v27 }
 0x107   :  { %v440_v28 = vpop.eup %439 }
 0x108   :  { %v442_v29 = vpop.eup %441  ;;  %v408_v30 = vadd.f32 %v440_v28, %v407_v62 }
 0x109   :  { %v412_v31 = vadd.f32 %v442_v29, %v411_v1 }
 0x10a   :  { %v300_v32 = vmax.f32 %v408_v30, 0.0 }
 0x10b   :  { %v299_v33 = vmax.f32 %v412_v31, 0.0 }
 0x10c   :  { %304 = vst [vmem:[#allocation2 + $0x8] sm:$0xff] %v300_v32 }
 0x10d   :  { %303 = vst [vmem:[#allocation2] sm:$0xff] %v299_v33 }
 0x10e   :  { %454 = shalt.err (!%p451_p4)
}
 0x10f   :  { %s455_s19 = scalar_lea.hbm %s608_s3, 512 }
 0x110   :  { %p456_p5 = scmp.ne.s32.totalorder %s608_s3, %s455_s19  ;;  %p459_p6 = scmp.lt.u32.totalorder %s455_s19, %s608_s3 }
 0x112   :  { %p461_p7 = pnand %p459_p6, %p456_p5 }
 0x114   :  { %464 = shalt.err (!%p461_p7)
}
 0x115   :  { %s469_s24 = smov 128   ;;  %s470_s25 = smov 8  }
 0x116   :  { %318 = dma.vmem_to_hbm [thread:$0]  %s313_s15, 512, %s608_s3, [#allocation3], %s469_s24, %s469_s24, %s470_s25  }
 0x117   :  { %465 = dma.done.wait [#allocation3], 512  }
 0x118   :  { %466 = vsyncadd [#allocation3], 4294966784 }
 0x119   :  { %322 = vsyncpa [#allocation3], 1 }

</bundles_post_ra>
